<compile_context>
chip_gen: v7x
topology: tpu7x:2x2x1
jax: 0.10.0
libtpu: 0.0.40
codegen_flags: <defaults>
</compile_context>

<pallas_src>
import math

import jax
import jax.numpy as jnp
import numpy as np
from jax.experimental import pallas as pl
from jax.experimental.pallas import tpu as pltpu


def _round_up(x: int, m: int) -> int:
    return ((x + m - 1) // m) * m


# --------------------------------------------------------------------------
# Kernels
# --------------------------------------------------------------------------
def _pe_rows_kernel(t_ref, f_ref, out_ref):
    """Direct layout: batch on sublanes, feature on lanes (half % 128 == 0).

    t_ref:   (TB, 1)       f32  timestep tile
    f_ref:   (1, half)     f32  frequencies (resident across the grid)
    out_ref: (TB, 2*half)  out  [cos | sin], both slabs lane-aligned
    """
    half = f_ref.shape[1]
    args = t_ref[...] * f_ref[...]                               # (TB, half) f32
    out_ref[:, :half] = jnp.cos(args).astype(out_ref.dtype)      # lane offset 0
    out_ref[:, half:] = jnp.sin(args).astype(out_ref.dtype)      # lane offset half (x128)


def _pe_cols_kernel(t_ref, f_ref, out_ref):
    """Transposed, lane-dense layout: batch on lanes (for half % 128 != 0).

    t_ref:   (1, TB)        f32  timestep tile (batch on lanes)
    f_ref:   (half, 1)      f32  frequencies (resident across the grid)
    out_ref: (2, half, TB)  out  slab 0 = cos, slab 1 = sin
    """
    args = f_ref[...] * t_ref[...]                               # (half, TB) f32
    out_ref[0, :, :] = jnp.cos(args).astype(out_ref.dtype)
    out_ref[1, :, :] = jnp.sin(args).astype(out_ref.dtype)


# --------------------------------------------------------------------------
# Tiling policy
# --------------------------------------------------------------------------
_PER_TILE_OUT_BYTES = 2 * 1024 * 1024   # per output tile -> <=4 MiB double-buffered (v5e safe)
_SPLIT_THRESHOLD = 2048                 # split big batches so v7x's 2 TCs both get work


def _pick_tile(b: int, row_bytes: int, granule: int) -> int:
    cap = max(granule, (_PER_TILE_OUT_BYTES // max(row_bytes, 1)) // granule * granule)
    if b <= cap:
        if b < _SPLIT_THRESHOLD:
            return b                                        # single full-extent block
        return max(granule, _round_up((b + 1) // 2, granule))   # exactly 2 blocks
    return cap                                              # >= 2 blocks of size cap


# --------------------------------------------------------------------------
# Public wrapper (forward of SinusoidalPositionalEncoding)
# --------------------------------------------------------------------------
def sinusoidal_positional_encoding(timesteps, dim: int, max_period: int = 10000,
                                   out_dtype=jnp.float32):
    """JAX/Pallas equivalent of SinusoidalPositionalEncoding.forward."""
    out_dtype = jnp.dtype(out_dtype)
    t = jnp.asarray(timesteps).astype(jnp.float32).reshape(-1)   # (B,)
    b = int(t.shape[0])
    half = dim // 2

    if half == 0:
        # Degenerate dim == 1: embedding is a single all-zero column.
        return jnp.squeeze(jnp.zeros((b, dim), out_dtype))

    # Host-precomputed frequencies (constant, resident across the grid).
    freqs = np.exp(
        -math.log(max_period) * np.arange(half, dtype=np.float32) / float(half))

    itemsize = out_dtype.itemsize
    row_bytes = 2 * half * itemsize

    if half % 128 == 0:
        # ---------------- direct layout: feature dim already lane-dense ----
        granule = 16 if itemsize == 2 else 8
        tb = _pick_tile(b, row_bytes, granule)
        grid = (pl.cdiv(b, tb),)
        b_pad = grid[0] * tb
        t2 = t.reshape(b, 1)
        if b_pad != b:
            # Padding the tiny timestep input is cheap; the out-of-range tail
            # writes of the last output block are masked by Pallas (no padded
            # output + slice round trip).
            t2 = jnp.pad(t2, ((0, b_pad - b), (0, 0)))

        emb = pl.pallas_call(
            _pe_rows_kernel,
            out_shape=jax.ShapeDtypeStruct((b, 2 * half), out_dtype),
            grid_spec=pltpu.PrefetchScalarGridSpec(
                num_scalar_prefetch=0,
                grid=grid,
                in_specs=[
                    pl.BlockSpec((tb, 1), lambda i: (i, 0)),        # timesteps tile
                    pl.BlockSpec((1, half), lambda i: (0, 0)),      # freqs (resident)
                ],
                out_specs=pl.BlockSpec((tb, 2 * half), lambda i: (i, 0)),
            ),
            compiler_params=pltpu.CompilerParams(
                dimension_semantics=("parallel",),
            ),
        )(t2, jnp.asarray(freqs).reshape(1, half))
    else:
        # ------------- transposed layout: batch on lanes (lane-dense) ------
        granule = 128
        tb = _pick_tile(b, row_bytes, granule)
        ngrid = pl.cdiv(b, tb)
        b_pad = ngrid * tb
        t2 = t.reshape(1, b)
        if b_pad != b:
            t2 = jnp.pad(t2, ((0, 0), (0, b_pad - b)))

        out = pl.pallas_call(
            _pe_cols_kernel,
            out_shape=jax.ShapeDtypeStruct((2, half, b_pad), out_dtype),
            grid_spec=pltpu.PrefetchScalarGridSpec(
                num_scalar_prefetch=0,
                grid=(ngrid,),
                in_specs=[
                    pl.BlockSpec((1, tb), lambda i: (0, i)),        # timesteps tile
                    pl.BlockSpec((half, 1), lambda i: (0, 0)),      # freqs (resident)
                ],
                out_specs=pl.BlockSpec((2, half, tb), lambda i: (0, 0, i)),
            ),
            compiler_params=pltpu.CompilerParams(
                dimension_semantics=("parallel",),
            ),
        )(t2, jnp.asarray(freqs).reshape(half, 1))

        # Layout plumbing back to (B, 2*half): one fused XLA slice+transpose.
        emb = jnp.transpose(out[:, :, :b], (2, 0, 1)).reshape(b, 2 * half)

    if dim % 2:
        emb = jnp.concatenate([emb, jnp.zeros((b, 1), out_dtype)], axis=-1)

    # Mimic torch's .squeeze(): drop all size-1 dims (B == 1 -> (dim,)).
    return jnp.squeeze(emb)


# --------------------------------------------------------------------------
# Pure-JAX reference + self-test
# --------------------------------------------------------------------------
def _reference(timesteps, dim, max_period=10000):
    half = dim // 2
    freqs = jnp.exp(
        -math.log(max_period) * jnp.arange(half, dtype=jnp.float32) / half)
    args = timesteps.astype(jnp.float32)[:, None] * freqs[None]
    emb = jnp.concatenate([jnp.cos(args), jnp.sin(args)], axis=-1)
    if dim % 2:
        emb = jnp.concatenate([emb, jnp.zeros_like(emb[:, :1])], axis=-1)
    return jnp.squeeze(emb)


if __name__ == "__main__":
    # 1) Typical diffusion timestep embedding: small batch, dim=32 (lane-dense
    #    transposed path).
    B, DIM = 8, 32
    timesteps = jax.random.randint(jax.random.PRNGKey(0), (B,), 0, 1000).astype(jnp.float32)
    out = jax.block_until_ready(sinusoidal_positional_encoding(timesteps, DIM))
    ref = _reference(timesteps, DIM)
    assert out.shape == ref.shape, (out.shape, ref.shape)
    assert jnp.allclose(out, ref, atol=2e-3, rtol=1e-3), "mismatch vs reference (dim=32)"

    # 2) Direct lane-aligned path (half % 128 == 0) with a batch that is not a
    #    multiple of the sublane granule.
    B2, DIM2 = 13, 256
    ts2 = jax.random.randint(jax.random.PRNGKey(1), (B2,), 0, 1000).astype(jnp.float32)
    out2 = jax.block_until_ready(sinusoidal_positional_encoding(ts2, DIM2))
    ref2 = _reference(ts2, DIM2)
    assert out2.shape == ref2.shape, (out2.shape, ref2.shape)
    assert jnp.allclose(out2, ref2, atol=2e-3, rtol=1e-3), "mismatch vs reference (dim=256)"

    # 3) Odd dim (extra zero column) on the transposed path.
    B3, DIM3 = 5, 33
    ts3 = jax.random.randint(jax.random.PRNGKey(2), (B3,), 0, 1000).astype(jnp.float32)
    out3 = jax.block_until_ready(sinusoidal_positional_encoding(ts3, DIM3))
    ref3 = _reference(ts3, DIM3)
    assert out3.shape == ref3.shape, (out3.shape, ref3.shape)
    assert jnp.allclose(out3, ref3, atol=2e-3, rtol=1e-3), "mismatch vs reference (odd dim)"

    print("KERNEL_OK")
</pallas_src>

<mosaic_0001>
module attributes {stable_mosaic.version = 11 : i64} {
  func.func @_pe_cols_kernel(%arg0: i32, %arg1: memref<1x8xf32, #tpu.memory_space<vmem>>, %arg2: memref<16x1xf32, #tpu.memory_space<vmem>>, %arg3: memref<2x16x8xf32, #tpu.memory_space<vmem>>) attributes {dimension_semantics = [#tpu.dimension_semantics<parallel>], iteration_bounds = array<i64: 1>, scalar_prefetch = 0 : i64, scratch_operands = 0 : i64, tpu.core_type = #tpu.core_type<tc>, window_params = [{transform_indices = @transform_0, window_bounds = array<i64: 1, 8>}, {pipeline_mode = #tpu.pipeline_mode<synchronous>, transform_indices = @transform_1, window_bounds = array<i64: 16, 1>}, {transform_indices = @transform_2, window_bounds = array<i64: 2, 16, 8>}]} {
    %c0 = arith.constant 0 : index
    %c0_0 = arith.constant 0 : index
    %0 = vector.load %arg2[%c0, %c0_0] : memref<16x1xf32, #tpu.memory_space<vmem>>, vector<16x1xf32>
    %c0_1 = arith.constant 0 : index
    %c0_2 = arith.constant 0 : index
    %1 = vector.load %arg1[%c0_1, %c0_2] : memref<1x8xf32, #tpu.memory_space<vmem>>, vector<1x8xf32>
    %2 = vector.broadcast %0 : vector<16x1xf32> to vector<16x8xf32>
    %3 = vector.broadcast %1 : vector<1x8xf32> to vector<16x8xf32>
    %4 = arith.mulf %2, %3 : vector<16x8xf32>
    %5 = math.cos %4 : vector<16x8xf32>
    %c0_3 = arith.constant 0 : index
    %c0_4 = arith.constant 0 : index
    %c0_5 = arith.constant 0 : index
    %6 = vector.load %arg3[%c0_3, %c0_4, %c0_5] : memref<2x16x8xf32, #tpu.memory_space<vmem>>, vector<1x16x8xf32>
    %7 = vector.shape_cast %6 : vector<1x16x8xf32> to vector<16x8xf32>
    %8 = vector.shape_cast %5 : vector<16x8xf32> to vector<1x16x8xf32>
    tpu.vector_store %arg3[%c0_3, %c0_4, %c0_5], %8 {strides = array<i32>} : memref<2x16x8xf32, #tpu.memory_space<vmem>>, vector<1x16x8xf32>,
    %9 = math.sin %4 : vector<16x8xf32>
    %c1 = arith.constant 1 : index
    %c0_6 = arith.constant 0 : index
    %c0_7 = arith.constant 0 : index
    %10 = vector.load %arg3[%c1, %c0_6, %c0_7] : memref<2x16x8xf32, #tpu.memory_space<vmem>>, vector<1x16x8xf32>
    %11 = vector.shape_cast %10 : vector<1x16x8xf32> to vector<16x8xf32>
    %12 = vector.shape_cast %9 : vector<16x8xf32> to vector<1x16x8xf32>
    tpu.vector_store %arg3[%c1, %c0_6, %c0_7], %12 {strides = array<i32>} : memref<2x16x8xf32, #tpu.memory_space<vmem>>, vector<1x16x8xf32>,
    return
  }
  func.func @transform_0(%arg0: i32) -> (i32, i32) {
    %c0_i32 = arith.constant 0 : i32
    %c0_i32_0 = arith.constant 0 : i32
    return %c0_i32, %arg0 : i32, i32
  }
  func.func @transform_1(%arg0: i32) -> (i32, i32) {
    %c0_i32 = arith.constant 0 : i32
    %c0_i32_0 = arith.constant 0 : i32
    %c0_i32_1 = arith.constant 0 : i32
    return %c0_i32, %c0_i32_0 : i32, i32
  }
  func.func @transform_2(%arg0: i32) -> (i32, i32, i32) {
    %c0_i32 = arith.constant 0 : i32
    %c0_i32_0 = arith.constant 0 : i32
    %c0_i32_1 = arith.constant 0 : i32
    return %c0_i32, %c0_i32_0, %arg0 : i32, i32, i32
  }
}

</mosaic_0001>

<bundles_post_ra>
// kernel: tpu_custom_call.1
= control target key start
LH: loop header
LB: loop body
LE: loop exit
PB: predicated region body
PF: predicated region fallthrough
CT: control target
= control target key end

     0   :  { %v499_v0 = vmov 0   ;;  %v500_v24 = vmov 683565275   ;;  %v501_v28 = vmov 2475754826   ;;  %s606_s1 = inlined_call_operand.vmem [shape: f32[16,1], index: 1, kind: input, shape index: {}]   ;;  %s607_s0 = inlined_call_operand.vmem [shape: f32[1,8], index: 0, kind: input, shape index: {}]   ;;  %s608_s2 = inlined_call_operand.vmem [shape: f32[2,16,8], index: 2, kind: output, shape index: {}]  }
   0x1   :  { %490 = vset.pattern.permute.xlu0 %v499_v0  ;;  %v11_v1 = vld [vmem:[%s606_s1] sm:$0xff]  ;;  %v12_v2 = vld [vmem:[%s606_s1 + $0x8] sm:$0xff]  ;;  %v502_v30 = vmov 2131351028   ;;  %v503_v32 = vmov 2102212464  }
   0x2   :  { %16 = vperm.xlu0 %490, %v11_v1   ;;  %v456_v3 = vld [vmem:[%s607_s0] ss:$0 sm:$0xff]  ;;  %v504_v34 = vmov 920167782   ;;  %v505_v41 = vmov 1326507024  }
   0x6   :  { %21 = vperm.xlu0 %490, %v12_v2  }
  0x81   :  { %v17_v4 = vpop.permute.xlu0 %16 }
  0x82   :  { %v530_v5 = vmul.f32 %v456_v3, %v17_v4 }
  0x84   :  { %v32_v6 = vand.u32 2147483647, %v530_v5  ;;  %v35_v7 = vand.u32 2139095040, %v530_v5  ;;  %vm34_vm14 = vcmp.lt.s32.totalorder %v530_v5, 0 }
  0x85   :  { %v22_v8 = vpop.permute.xlu0 %21 }
  0x86   :  { %v36_v9 = vshrl.u32 %v35_v7, 23  ;;  %v534_v10 = vmul.f32 %v456_v3, %v22_v8  ;;  %v39_v11 = vand.u32 8388607, %v32_v6  ;;  %vm33_vm15 = vcmp.le.f32.partialorder %v32_v6, 0.7853982 }
  0x88   :  { %v457_v12 = vadd.s32 4294967169, %v36_v9  ;;  %v138_v13 = vand.u32 2139095040, %v534_v10  ;;  %v40_v15 = vor.u32 8388608, %v39_v11  ;;  %v135_v17 = vand.u32 2147483647, %v534_v10 }
  0x8a   :  { %v42_v14 = vadd.s32 1, %v457_v12  ;;  %v139_v16 = vshrl.u32 %v138_v13, 23  ;;  %v540_v22 = vshll.u32 %v40_v15, 8  ;;  %v142_v26 = vand.u32 8388607, %v135_v17 }
  0x8c   :  { %vm43_vm0 = vcmp.gt.s32.totalorder %v42_v14, 0  ;;  %v461_v19 = vadd.s32 4294967169, %v139_v16  ;;  %v143_v56 = vor.u32 8388608, %v142_v26 }
  0x8d   :  { %v44_v18 = vsel %vm43_vm0, %v42_v14, 0  ;;  %vm137_vm0 = vcmp.lt.s32.totalorder %v534_v10, 0 }
  0x8e   :  { %v45_v20 = vshrl.u32 %v44_v18, 5  ;;  %v46_v21 = vand.u32 31, %v44_v18  ;;  %v145_v27 = vadd.s32 1, %v461_v19  ;;  %v183_v7 = vshll.u32 %v143_v56, 8 }
  0x90   :  { %v47_v23 = vsub.s32 32, %v46_v21  ;;  %v49_v25 = vshll.u32 %v500_v24, %v46_v21  ;;  %v52_v29 = vshll.u32 %v501_v28, %v46_v21  ;;  %v55_v31 = vshll.u32 %v502_v30, %v46_v21 }
  0x91   :  { %v58_v33 = vshll.u32 %v503_v32, %v46_v21  ;;  %v61_v35 = vshll.u32 %v504_v34, %v46_v21  ;;  %vm64_vm1 = vcmp.lt.s32.totalorder %v45_v20, 1  ;;  %vm66_vm2 = vcmp.lt.s32.totalorder %v45_v20, 3 }
  0x92   :  { %v50_v36 = vshrl.u32 %v501_v28, %v47_v23  ;;  %v53_v37 = vshrl.u32 %v502_v30, %v47_v23  ;;  %v56_v38 = vshrl.u32 %v503_v32, %v47_v23  ;;  %v48_v39 = vshrl.u32 %v500_v24, %v47_v23 }
  0x93   :  { %v59_v40 = vshrl.u32 %v504_v34, %v47_v23  ;;  %v62_v42 = vshrl.u32 %v505_v41, %v47_v23  ;;  %vm146_vm3 = vcmp.gt.s32.totalorder %v145_v27, 0  ;;  %vm67_vm4 = vcmp.lt.s32.totalorder %v45_v20, 4 }
  0x94   :  { %v51_v43 = vor.u32 %v50_v36, %v49_v25  ;;  %v54_v44 = vor.u32 %v53_v37, %v52_v29  ;;  %v57_v45 = vor.u32 %v56_v38, %v55_v31  ;;  %v147_v48 = vsel %vm146_vm3, %v145_v27, 0 }
  0x95   :  { %v60_v46 = vor.u32 %v59_v40, %v58_v33  ;;  %v63_v47 = vor.u32 %v62_v42, %v61_v35  ;;  %vm65_vm5 = vcmp.lt.s32.totalorder %v45_v20, 2  ;;  %v149_v59 = vand.u32 31, %v147_v48 }
  0x96   :  { %v68_v49 = vsel %vm64_vm1, %v48_v39, %v51_v43  ;;  %v69_v50 = vsel %vm67_vm4, %v57_v45, 2102212464  ;;  %v72_v51 = vsel %vm64_vm1, %v51_v43, %v54_v44  ;;  %v76_v52 = vsel %vm64_vm1, %v54_v44, %v57_v45 }
  0x97   :  { %v70_v53 = vsel %vm66_vm2, %v54_v44, %v69_v50  ;;  %v73_v54 = vsel %vm67_vm4, %v60_v46, 920167782  ;;  %v77_v55 = vsel %vm67_vm4, %v63_v47, 1326507024  ;;  %v148_v3 = vshrl.u32 %v147_v48, 5 }
  0x98   :  { %v74_v57 = vsel %vm66_vm2, %v57_v45, %v73_v54  ;;  %v78_v58 = vsel %vm66_vm2, %v60_v46, %v77_v55  ;;  %v71_v60 = vsel %vm65_vm5, %v68_v49, %v70_v53  ;;  %v150_v4 = vsub.s32 32, %v149_v59 }
  0x99   :  { %v75_v61 = vsel %vm65_vm5, %v72_v51, %v74_v57  ;;  %v79_v62 = vsel %vm65_vm5, %v76_v52, %v78_v58  ;;  %v87_v8 = vmul.u32 %v540_v22, %v71_v60  ;;  %v152_v9 = vshll.u32 %v500_v24, %v149_v59 }
  0x9a   :  { %v553_v63 = vmul.u32.u64.low %v540_v22, %v79_v62  ;;  %v554_v0 = vmul.u32.u64.high %v540_v22, %v79_v62, %v553_v63  ;;  %v557_v1 = vmul.u32.u64.low %v540_v22, %v75_v61  ;;  %v558_v2 = vmul.u32.u64.high %v540_v22, %v75_v61, %v557_v1 }
  0x9b   :  { %v155_v11 = vshll.u32 %v501_v28, %v149_v59  ;;  %v158_v12 = vshll.u32 %v502_v30, %v149_v59  ;;  %v153_v13 = vshrl.u32 %v501_v28, %v150_v4  ;;  %v156_v14 = vshrl.u32 %v502_v30, %v150_v4 }
  0x9c   :  { %v159_v15 = vshrl.u32 %v503_v32, %v150_v4  ;;  %v161_v16 = vshll.u32 %v503_v32, %v149_v59  ;;  %vm89_vm6 = vc.u32 %v554_v0, %v557_v1  ;;  %v90_v18 = vadd.s32 1, %v558_v2 }
  0x9d   :  { %v162_v19 = vshrl.u32 %v504_v34, %v150_v4  ;;  %v164_v20 = vshll.u32 %v504_v34, %v149_v59  ;;  %v154_v21 = vor.u32 %v153_v13, %v152_v9  ;;  %v157_v23 = vor.u32 %v156_v14, %v155_v11 }
  0x9e   :  { %v160_v25 = vor.u32 %v159_v15, %v158_v12  ;;  %v165_v26 = vshrl.u32 %v505_v41, %v150_v4  ;;  %v91_v22 = vsel %vm89_vm6, %v90_v18, %v558_v2  ;;  %vm167_vm7 = vcmp.lt.s32.totalorder %v148_v3, 1 }
  0x9f   :  { %v163_v27 = vor.u32 %v162_v19, %v161_v16  ;;  %vm170_vm8 = vcmp.lt.s32.totalorder %v148_v3, 4  ;;  %v92_v28 = vadd.s32 %v91_v22, %v87_v8  ;;  %vm169_vm9 = vcmp.lt.s32.totalorder %v148_v3, 3 }
  0xa0   :  { %v166_v29 = vor.u32 %v165_v26, %v164_v20  ;;  %v172_v30 = vsel %vm170_vm8, %v160_v25, 2102212464  ;;  %v151_v31 = vshrl.u32 %v500_v24, %v150_v4  ;;  %v175_v32 = vsel %vm167_vm7, %v154_v21, %v157_v23 }
  0xa1   :  { %v176_v33 = vsel %vm170_vm8, %v163_v27, 920167782  ;;  %v179_v35 = vsel %vm167_vm7, %v157_v23, %v160_v25  ;;  %v93_v36 = vadd.s32 536870912, %v92_v28  ;;  %vm168_vm10 = vcmp.lt.s32.totalorder %v148_v3, 2 }
  0xa2   :  { %v177_v34 = vsel %vm169_vm9, %v160_v25, %v176_v33  ;;  %v180_v37 = vsel %vm170_vm8, %v166_v29, 1326507024  ;;  %v171_v38 = vsel %vm167_vm7, %v151_v31, %v154_v21  ;;  %v173_v39 = vsel %vm169_vm9, %v157_v23, %v172_v30 }
  0xa3   :  { %v178_v40 = vsel %vm168_vm10, %v175_v32, %v177_v34  ;;  %v181_v41 = vsel %vm169_vm9, %v163_v27, %v180_v37  ;;  %v94_v42 = vshrl.u32 %v93_v36, 30  ;;  %v174_v48 = vsel %vm168_vm10, %v171_v38, %v173_v39 }
  0xa4   :  { %v182_v43 = vsel %vm168_vm10, %v179_v35, %v181_v41  ;;  %v568_v44 = vmul.u32.u64.low %v183_v7, %v178_v40  ;;  %v569_v45 = vmul.u32.u64.high %v183_v7, %v178_v40, %v568_v44  ;;  %v190_v51 = vmul.u32 %v183_v7, %v174_v48 }
  0xa5   :  { %v571_v46 = vmul.u32.u64.low %v183_v7, %v182_v43  ;;  %v572_v47 = vmul.u32.u64.high %v183_v7, %v182_v43, %v571_v46  ;;  %v95_v24 = vshll.u32 %v94_v42, 30  ;;  %v88_v63 = vadd.s32 %v557_v1, %v554_v0 }
  0xa6   :  { %v193_v50 = vadd.s32 1, %v569_v45  ;;  %v118_v21 = vsub.s32 4, %v94_v42  ;;  %vm136_vm1 = vcmp.le.f32.partialorder %v135_v17, 0.7853982  ;;  %vm238_vm2 = vcmask 64512  }
  0xa7   :  { %v96_v49 = vsub.s32 %v92_v28, %v95_v24  ;;  %vm192_vm11 = vc.u32 %v572_v47, %v568_v44  ;;  %v191_v0 = vadd.s32 %v568_v44, %v572_v47  ;;  %vm124_vm9 = vweird.f32 %v530_v5 }
  0xa8   :  { %v194_v53 = vsel %vm192_vm11, %v193_v50, %v569_v45  ;;  %v119_v30 = vsel %vm34_vm14, %v118_v21, %v94_v42 }
  0xa9   :  { %v98_v52 = vsub.s32 0, %v96_v49  ;;  %v195_v54 = vadd.s32 %v194_v53, %v190_v51  ;;  %v121_v35 = vsel %vm33_vm15, 0, %v119_v30 }
  0xaa   :  { %v334_v38 = vadd.s32 3, %v121_v35  ;;  %v125_v41 = vand.u32 3, %v121_v35 }
  0xab   :  { %v458_v55 = vmin.u32 %v98_v52, %v96_v49  ;;  %v196_v56 = vadd.s32 536870912, %v195_v54 }
  0xac   :  { %v335_v44 = vand.u32 3, %v334_v38  ;;  %vm130_vm3 = vcmp.eq.s32.totalorder %v125_v41, 2  ;;  %vm127_vm5 = vcmp.eq.s32.totalorder %v125_v41, 0  ;;  %vm126_vm7 = vcmp.lt.s32.totalorder %v125_v41, 2 }
  0xad   :  { %v100_v57 = vclz %v458_v55  ;;  %v197_v58 = vshrl.u32 %v196_v56, 30 }
  0xae   :  { %vm340_vm4 = vcmp.eq.s32.totalorder %v335_v44, 2  ;;  %vm337_vm6 = vcmp.eq.s32.totalorder %v335_v44, 0  ;;  %vm336_vm8 = vcmp.lt.s32.totalorder %v335_v44, 2 }
  0xaf   :  { %v459_v59 = vadd.s32 4294967294, %v100_v57  ;;  %v198_v60 = vshll.u32 %v197_v58, 30  ;;  %v221_v40 = vsub.s32 4, %v197_v58 }
  0xb1   :  { %vm460_vm12 = vcmp.lt.s32.totalorder %v459_v59, 0  ;;  %v199_v62 = vsub.s32 %v195_v54, %v198_v60  ;;  %v222_v42 = vsel %vm137_vm0, %v221_v40, %v197_v58 }
  0xb2   :  { %v103_v61 = vsel %vm460_vm12, 0, %v459_v59 }
  0xb3   :  { %v104_v2 = vsub.s32 32, %v103_v61  ;;  %v108_v3 = vsub.s32 4294967266, %v103_v61  ;;  %v201_v4 = vsub.s32 0, %v199_v62  ;;  %v105_v7 = vshll.u32 %v96_v49, %v103_v61 }
  0xb4   :  { %v224_v49 = vsel %vm136_vm1, 0, %v222_v42 }
  0xb5   :  { %v106_v8 = vshrl.u32 %v88_v63, %v104_v2  ;;  %v109_v9 = vadd.s32 127, %v108_v3  ;;  %v462_v11 = vmin.u32 %v201_v4, %v199_v62  ;;  %v438_v55 = vadd.s32 3, %v224_v49 }
  0xb6   :  { %v228_v58 = vand.u32 3, %v224_v49 }
  0xb7   :  { %v107_v12 = vor.u32 %v106_v8, %v105_v7  ;;  %v110_v13 = vshll.u32 %v109_v9, 23  ;;  %v203_v14 = vclz %v462_v11  ;;  %v439_v59 = vand.u32 3, %v438_v55 }
  0xb8   :  { %vm233_vm10 = vcmp.eq.s32.totalorder %v228_v58, 2  ;;  %vm230_vm12 = vcmp.eq.s32.totalorder %v228_v58, 0 }
  0xb9   :  { %v111_v15 = vor.u32 4788187, %v110_v13  ;;  %v463_v16 = vadd.s32 4294967294, %v203_v14  ;;  %v114_v19 = vcvt.s32.f32 %v107_v12  ;;  %vm444_vm11 = vcmp.eq.s32.totalorder %v439_v59, 2 }
  0xbb   :  { %v112_v18 = vand.u32 2147483647, %v111_v15  ;;  %vm464_vm13 = vcmp.lt.s32.totalorder %v463_v16, 0 }
  0xbc   :  { %v206_v23 = vsel %vm464_vm13, 0, %v463_v16  ;;  %vm441_vm13 = vcmp.eq.s32.totalorder %v439_v59, 0 }
  0xbd   :  { %v115_v20 = vmul.f32 %v114_v19, %v112_v18  ;;  %v207_v1 = vsub.s32 32, %v206_v23  ;;  %v211_v25 = vsub.s32 4294967266, %v206_v23  ;;  %v208_v22 = vshll.u32 %v199_v62, %v206_v23 }
  0xbf   :  { %v116_v26 = vxor.u32 2147483648, %v115_v20  ;;  %v209_v27 = vshrl.u32 %v191_v0, %v207_v1  ;;  %v212_v28 = vadd.s32 127, %v211_v25 }
  0xc1   :  { %v117_v29 = vsel %vm34_vm14, %v116_v26, %v115_v20  ;;  %v210_v32 = vor.u32 %v209_v27, %v208_v22  ;;  %v213_v33 = vshll.u32 %v212_v28, 23  ;;  %vm229_vm14 = vcmp.lt.s32.totalorder %v228_v58, 2 }
  0xc2   :  { %v120_v31 = vsel %vm33_vm15, %v530_v5, %v117_v29  ;;  %vm440_vm15 = vcmp.lt.s32.totalorder %v439_v59, 2 }
  0xc3   :  { %491 = vcosq.f32 %v120_v31  ;;  %v214_v36 = vor.u32 4788187, %v213_v33  ;;  %v217_v37 = vcvt.s32.f32 %v210_v32 }
  0xc4   :  { %493 = vsinq.f32 %v120_v31 }
  0xc5   :  { %v215_v34 = vand.u32 2147483647, %v214_v36 }
  0xc7   :  { %v218_v39 = vmul.f32 %v217_v37, %v215_v34 }
  0xc9   :  { %v219_v43 = vxor.u32 2147483648, %v218_v39 }
  0xcb   :  { %v220_v6 = vsel %vm137_vm0, %v219_v43, %v218_v39  ;;  %vm227_vm0 = vweird.f32 %v534_v10 }
  0xcc   :  { %v223_v46 = vsel %vm136_vm1, %v534_v10, %v220_v6 }
  0xcd   :  { %v492_v45 = vpop.eup %491  ;;  %495 = vcosq.f32 %v223_v46 }
  0xce   :  { %v494_v47 = vpop.eup %493  ;;  %v131_v24 = vxor.u32 2147483648, %v492_v45  ;;  %497 = vsinq.f32 %v223_v46 }
  0xcf   :  { %v128_v48 = vxor.u32 2147483648, %v494_v47 }
  0xd0   :  { %v132_v50 = vsel %vm130_vm3, %v131_v24, %v494_v47  ;;  %v342_v51 = vsel %vm340_vm4, %v131_v24, %v494_v47 }
  0xd1   :  { %v129_v17 = vsel %vm127_vm5, %v492_v45, %v128_v48  ;;  %v339_v52 = vsel %vm337_vm6, %v492_v45, %v128_v48 }
  0xd2   :  { %v133_v53 = vsel %vm126_vm7, %v129_v17, %v132_v50  ;;  %v343_v54 = vsel %vm336_vm8, %v339_v52, %v342_v51 }
  0xd3   :  { %v134_v56 = vsel %vm124_vm9, nan, %v133_v53  ;;  %v344_v57 = vsel %vm124_vm9, nan, %v343_v54 }
  0xd4   :  { %239 = vst.msk [vmem:[%s608_s2] sm:$0xff] %vm238_vm2, %v134_v56  ;;  %473 = vst.msk [vmem:[%s608_s2 + $0x10] sm:$0xff] %vm238_vm2, %v344_v57 }
  0xd7   :  { %v496_v60 = vpop.eup %495 }
  0xd8   :  { %v498_v61 = vpop.eup %497  ;;  %v234_v5 = vxor.u32 2147483648, %v496_v60 }
  0xd9   :  { %v231_v62 = vxor.u32 2147483648, %v498_v61 }
  0xda   :  { %v235_v63 = vsel %vm233_vm10, %v234_v5, %v498_v61  ;;  %v446_v2 = vsel %vm444_vm11, %v234_v5, %v498_v61 }
  0xdb   :  { %v232_v3 = vsel %vm230_vm12, %v496_v60, %v231_v62  ;;  %v443_v4 = vsel %vm441_vm13, %v496_v60, %v231_v62 }
  0xdc   :  { %v236_v7 = vsel %vm229_vm14, %v232_v3, %v235_v63  ;;  %v447_v8 = vsel %vm440_vm15, %v443_v4, %v446_v2 }
  0xdd   :  { %v237_v9 = vsel %vm227_vm0, nan, %v236_v7  ;;  %v448_v11 = vsel %vm227_vm0, nan, %v447_v8 }
  0xde   :  { %240 = vst.msk [vmem:[%s608_s2 + $0x8] sm:$0xff] %vm238_vm2, %v237_v9  ;;  %474 = vst.msk [vmem:[%s608_s2 + $0x18] sm:$0xff] %vm238_vm2, %v448_v11 }

</bundles_post_ra>
